<compile_context>
chip_gen: v5e
topology: v5e:2x2
jax: 0.10.0
libtpu: 0.0.40
codegen_flags: <defaults>
</compile_context>

<pallas_src>
import functools

import jax
import jax.numpy as jnp
from jax import lax
from jax.experimental import pallas as pl
from jax.experimental.pallas import tpu as pltpu


def cross_attention_kernel(x_ref, qeff_ref, bv_ref, wvc_ref, gb_ref, o_ref):
    """Single grid step: all B batch elements processed together.

    x_ref : (B, C, HW) f32, NCHW-flat (channels on sublanes, HW on lanes)
    qeff_ref : (1, C)   q_eff = (mu Wq^T + bq) Wk / sqrt(C)   (pre-scaled)
    bv_ref   : (C, 1)   value-projection bias
    wvc_ref  : (2, C, C)   [Wv | Wconv]
    gb_ref   : (2, C, HW)  [gamma | bias_slab = Wc@beta + bc]
    """
    B, C, HW = x_ref.shape
    n = C * HW                                     # LN element count per batch

    q_eff = qeff_ref[...]                          # (1, C)
    bv = bv_ref[...]                               # (C, 1)
    wv = wvc_ref[0]                                # (C, C)
    wc = wvc_ref[1]                                # (C, C)
    gamma = gb_ref[0]                              # (C, HW)
    bias_slab = gb_ref[1]                          # (C, HW) = Wc @ beta + bc

    # Load each batch slab once; lane-concatenate so every MXU op sees N=B*HW.
    xs = [x_ref[b] for b in range(B)]              # each (C, HW)
    x_cat = jnp.concatenate(xs, axis=-1)           # (C, B*HW)

    # ---- off-critical-path work (independent of the softmax chain) ----------
    # Per-batch LayerNorm partial statistics of x (overlap with scores/softmax).
    rowsum = [jnp.sum(xb, axis=-1, keepdims=True) for xb in xs]     # (C, 1)
    s_x = [jnp.sum(rs) for rs in rowsum]                            # scalar
    q_x = [jnp.sum(xb * xb) for xb in xs]                           # scalar
    # Value projection of the whole slab.  ctx = (Wv x + bv 1^T) attn^T is
    # exact because attn sums to 1 (eval mode), so bv folds in here.
    wvx = jnp.dot(wv, x_cat, preferred_element_type=jnp.float32) + bv  # (C, B*HW)

    # ---- attention scores (one lane-dense MXU push) + per-batch softmax -----
    # scores_j = q_eff . x_j ; the constant q.bk term is dropped (softmax is
    # shift-invariant), and the 1/sqrt(C) scale is folded into q_eff.
    scores = jnp.dot(q_eff, x_cat, preferred_element_type=jnp.float32)  # (1, B*HW)
    # Dropout(p=0.1) on attention weights is identity in eval mode.
    attn = []
    for b in range(B):
        sb = scores[:, b * HW:(b + 1) * HW]                          # (1, HW)
        m = jnp.max(sb, axis=-1, keepdims=True)
        e = jnp.exp(sb - m)
        # exact reciprocal kept (approx=True costs ~1e-4 rel. error)
        attn.append(e * pl.reciprocal(jnp.sum(e, axis=-1, keepdims=True),
                                      approx=False))

    # ---- context + LayerNorm + conv-input prep, per batch -------------------
    ngs = []
    for b in range(B):
        # ctx = (Wv x_b + bv) attn_b^T via VPU mul + XLU lane-reduce: keeps the
        # post-softmax chain off the MXU (no dependent N=1 push/drain).
        ctx = jnp.sum(wvx[:, b * HW:(b + 1) * HW] * attn[b],
                      axis=-1, keepdims=True)                        # (C, 1)

        # LayerNorm statistics of combined = x + ctx via O(C) fixups on the
        # precomputed x statistics (biased variance, eps=1e-5, PyTorch LN).
        csum = jnp.sum(ctx)
        s_tot = s_x[b] + HW * csum
        q_tot = q_x[b] + 2.0 * jnp.sum(ctx * rowsum[b]) + HW * jnp.sum(ctx * ctx)
        mean = s_tot / n
        var = q_tot / n - mean * mean
        inv = lax.rsqrt(var + 1e-5)

        combined = xs[b] + ctx                                       # (C, HW)
        ngs.append((combined - mean) * (inv * gamma))                # normed*gamma

    # ---- 1x1 conv == channel matmul, one MXU op with N = B*HW ---------------
    ng_cat = jnp.concatenate(ngs, axis=-1)                           # (C, B*HW)
    conv = jnp.dot(wc, ng_cat, preferred_element_type=jnp.float32)   # (C, B*HW)
    for b in range(B):
        # conv bias and LN beta already folded into bias_slab = Wc@beta + bc
        o_ref[b] = jnp.maximum(conv[:, b * HW:(b + 1) * HW] + bias_slab, 0.0)


def cross_attention_layer(mu, spatial_feature, params):
    """mu: (1, 1, C);  spatial_feature: (B, C, H, W)  (NCHW, like PyTorch)."""
    B, C, H, W = spatial_feature.shape
    HW = H * W

    # Native NCHW flatten — pure reshape, no transpose.
    x = spatial_feature.reshape(B, C, HW).astype(jnp.float32)

    wq, bq = params["wq"], params["bq"]
    wk = params["wk"]
    wv, bv = params["wv"], params["bv"]
    gamma = params["gamma"].reshape(C, HW)
    beta = params["beta"].reshape(C, HW)
    wc = params["wc"].reshape(C, C)
    bc = params["bc"]

    # Batch-invariant precompute (tiny XLA ops, done once per call):
    #   q     = mu Wq^T + bq
    #   q_eff = (q Wk) / sqrt(C)          (q . bk dropped — softmax shift-invariant)
    #   bias_slab = Wc @ beta + bc        (conv is linear; exact fold)
    q = mu.reshape(1, C).astype(jnp.float32) @ wq.T + bq.reshape(1, C)
    q_eff = (q @ wk) * (1.0 / jnp.sqrt(jnp.float32(C)))              # (1, C)
    bias_slab = wc @ beta + bc.reshape(C, 1)                          # (C, HW)

    wvc = jnp.stack([wv, wc], axis=0)                                 # (2, C, C)
    gb = jnp.stack([gamma, bias_slab], axis=0)                        # (2, C, HW)
    bv_col = bv.reshape(C, 1)

    out = pl.pallas_call(
        cross_attention_kernel,
        out_shape=jax.ShapeDtypeStruct((B, C, HW), jnp.float32),
        grid=(1,),                                   # single step: B folded into lanes
        in_specs=[
            pl.BlockSpec((B, C, HW), lambda i: (0, 0, 0)),   # x (NCHW-flat)
            pl.BlockSpec((1, C), lambda i: (0, 0)),          # q_eff (pre-scaled)
            pl.BlockSpec((C, 1), lambda i: (0, 0)),          # bv
            pl.BlockSpec((2, C, C), lambda i: (0, 0, 0)),    # [Wv | Wconv]
            pl.BlockSpec((2, C, HW), lambda i: (0, 0, 0)),   # [gamma | bias_slab]
        ],
        out_specs=pl.BlockSpec((B, C, HW), lambda i: (0, 0, 0)),
        compiler_params=pltpu.CompilerParams(
            dimension_semantics=("arbitrary",)),
    )(x, q_eff, bv_col, wvc, gb)

    # NCHW restore — pure reshape, no transpose.
    return out.reshape(B, C, H, W)


def reference_forward(mu, spatial, params):
    """Pure-JAX reference mirroring the PyTorch module (eval mode)."""
    B, C, H, W = spatial.shape
    HW = H * W
    q = mu @ params["wq"].T + params["bq"]                       # (1, 1, C)
    flat = jnp.transpose(spatial.reshape(B, C, HW), (0, 2, 1))   # (B, HW, C)
    k = flat @ params["wk"].T + params["bk"]
    v = flat @ params["wv"].T + params["bv"]
    qb = jnp.broadcast_to(q, (B, 1, C))
    scores = jnp.einsum("bqc,bkc->bqk", qb, k) / jnp.sqrt(jnp.float32(C))
    attn = jax.nn.softmax(scores, axis=-1)
    ctx = jnp.einsum("bqk,bkc->bqc", attn, v)                    # (B, 1, C)
    ctx_b = ctx.reshape(B, C, 1, 1)
    combined = spatial + ctx_b
    mean = combined.mean(axis=(1, 2, 3), keepdims=True)
    var = ((combined - mean) ** 2).mean(axis=(1, 2, 3), keepdims=True)
    normed = (combined - mean) / jnp.sqrt(var + 1e-5)
    normed = normed * params["gamma"][None] + params["beta"][None]
    wc = params["wc"].reshape(C, C)
    out = jnp.einsum("oc,bchw->bohw", wc, normed) + params["bc"][None, :, None, None]
    return jax.nn.relu(out)


def make_params(key, feature_dim, spatial_dim):
    C, S = feature_dim, spatial_dim
    ks = jax.random.split(key, 10)
    p = {
        "wq": 0.1 * jax.random.normal(ks[0], (C, C), jnp.float32),
        "bq": 0.1 * jax.random.normal(ks[1], (C,), jnp.float32),
        "wk": 0.1 * jax.random.normal(ks[2], (C, C), jnp.float32),
        "bk": 0.1 * jax.random.normal(ks[3], (C,), jnp.float32),
        "wv": 0.1 * jax.random.normal(ks[4], (C, C), jnp.float32),
        "bv": 0.1 * jax.random.normal(ks[5], (C,), jnp.float32),
        "gamma": 1.0 + 0.05 * jax.random.normal(ks[6], (C, S, S), jnp.float32),
        "beta": 0.05 * jax.random.normal(ks[7], (C, S, S), jnp.float32),
        "wc": 0.1 * jax.random.normal(ks[8], (C, C, 1, 1), jnp.float32),
        "bc": 0.1 * jax.random.normal(ks[9], (C,), jnp.float32),
    }
    return p


if __name__ == "__main__":
    B, C, S = 2, 32, 16          # batch, feature_dim, spatial_dim
    key = jax.random.PRNGKey(0)
    k_mu, k_sp, k_p = jax.random.split(key, 3)

    mu = jax.random.normal(k_mu, (1, 1, C), jnp.float32)
    spatial_feature = jax.random.normal(k_sp, (B, C, S, S), jnp.float32)
    params = make_params(k_p, C, S)

    out = jax.jit(functools.partial(cross_attention_layer, params=params))(
        mu, spatial_feature)
    out = jax.block_until_ready(out)

    ref = reference_forward(mu, spatial_feature, params)
    assert out.shape == (B, C, S, S)
    assert jnp.allclose(out, ref, atol=1e-4, rtol=1e-4), \
        f"max abs err {jnp.max(jnp.abs(out - ref))}"

    print("KERNEL_OK")
</pallas_src>

<mosaic_0001>
module attributes {stable_mosaic.version = 11 : i64} {
  func.func @cross_attention_kernel(%arg0: i32, %arg1: memref<2x32x256xf32, #tpu.memory_space<vmem>>, %arg2: memref<1x32xf32, #tpu.memory_space<vmem>>, %arg3: memref<32x1xf32, #tpu.memory_space<vmem>>, %arg4: memref<2x32x32xf32, #tpu.memory_space<vmem>>, %arg5: memref<2x32x256xf32, #tpu.memory_space<vmem>>, %arg6: memref<2x32x256xf32, #tpu.memory_space<vmem>>) attributes {dimension_semantics = [#tpu.dimension_semantics<arbitrary>], iteration_bounds = array<i64: 1>, scalar_prefetch = 0 : i64, scratch_operands = 0 : i64, tpu.core_type = #tpu.core_type<tc>, window_params = [{pipeline_mode = #tpu.pipeline_mode<synchronous>, transform_indices = @transform_0, window_bounds = array<i64: 2, 32, 256>}, {pipeline_mode = #tpu.pipeline_mode<synchronous>, transform_indices = @transform_1, window_bounds = array<i64: 1, 32>}, {pipeline_mode = #tpu.pipeline_mode<synchronous>, transform_indices = @transform_2, window_bounds = array<i64: 32, 1>}, {pipeline_mode = #tpu.pipeline_mode<synchronous>, transform_indices = @transform_3, window_bounds = array<i64: 2, 32, 32>}, {pipeline_mode = #tpu.pipeline_mode<synchronous>, transform_indices = @transform_4, window_bounds = array<i64: 2, 32, 256>}, {pipeline_mode = #tpu.pipeline_mode<synchronous>, transform_indices = @transform_5, window_bounds = array<i64: 2, 32, 256>}]} {
    %c0 = arith.constant 0 : index
    %c0_0 = arith.constant 0 : index
    %0 = vector.load %arg2[%c0, %c0_0] : memref<1x32xf32, #tpu.memory_space<vmem>>, vector<1x32xf32>
    %c0_1 = arith.constant 0 : index
    %c0_2 = arith.constant 0 : index
    %1 = vector.load %arg3[%c0_1, %c0_2] : memref<32x1xf32, #tpu.memory_space<vmem>>, vector<32x1xf32>
    %c0_3 = arith.constant 0 : index
    %c0_4 = arith.constant 0 : index
    %c0_5 = arith.constant 0 : index
    %2 = vector.load %arg4[%c0_3, %c0_4, %c0_5] : memref<2x32x32xf32, #tpu.memory_space<vmem>>, vector<1x32x32xf32>
    %3 = vector.shape_cast %2 : vector<1x32x32xf32> to vector<32x32xf32>
    %c1 = arith.constant 1 : index
    %c0_6 = arith.constant 0 : index
    %c0_7 = arith.constant 0 : index
    %4 = vector.load %arg4[%c1, %c0_6, %c0_7] : memref<2x32x32xf32, #tpu.memory_space<vmem>>, vector<1x32x32xf32>
    %5 = vector.shape_cast %4 : vector<1x32x32xf32> to vector<32x32xf32>
    %c0_8 = arith.constant 0 : index
    %c0_9 = arith.constant 0 : index
    %c0_10 = arith.constant 0 : index
    %6 = vector.load %arg5[%c0_8, %c0_9, %c0_10] : memref<2x32x256xf32, #tpu.memory_space<vmem>>, vector<1x32x256xf32>
    %7 = vector.shape_cast %6 : vector<1x32x256xf32> to vector<32x256xf32>
    %c1_11 = arith.constant 1 : index
    %c0_12 = arith.constant 0 : index
    %c0_13 = arith.constant 0 : index
    %8 = vector.load %arg5[%c1_11, %c0_12, %c0_13] : memref<2x32x256xf32, #tpu.memory_space<vmem>>, vector<1x32x256xf32>
    %9 = vector.shape_cast %8 : vector<1x32x256xf32> to vector<32x256xf32>
    %c0_14 = arith.constant 0 : index
    %c0_15 = arith.constant 0 : index
    %c0_16 = arith.constant 0 : index
    %10 = vector.load %arg1[%c0_14, %c0_15, %c0_16] : memref<2x32x256xf32, #tpu.memory_space<vmem>>, vector<1x32x256xf32>
    %11 = vector.shape_cast %10 : vector<1x32x256xf32> to vector<32x256xf32>
    %c1_17 = arith.constant 1 : index
    %c0_18 = arith.constant 0 : index
    %c0_19 = arith.constant 0 : index
    %12 = vector.load %arg1[%c1_17, %c0_18, %c0_19] : memref<2x32x256xf32, #tpu.memory_space<vmem>>, vector<1x32x256xf32>
    %13 = vector.shape_cast %12 : vector<1x32x256xf32> to vector<32x256xf32>
    %14 = tpu.concatenate %11, %13 in 1 : vector<32x256xf32>, vector<32x256xf32> -> vector<32x512xf32>
    %cst = arith.constant dense<0.000000e+00> : vector<32xf32>
    %15 = vector.multi_reduction <add>, %11, %cst [1] : vector<32x256xf32> to vector<32xf32>
    %16 = vector.shape_cast %15 : vector<32xf32> to vector<32x1xf32>
    %cst_20 = arith.constant dense<0.000000e+00> : vector<32xf32>
    %17 = vector.multi_reduction <add>, %13, %cst_20 [1] : vector<32x256xf32> to vector<32xf32>
    %18 = vector.shape_cast %17 : vector<32xf32> to vector<32x1xf32>
    %19 = vector.shape_cast %16 : vector<32x1xf32> to vector<1x32x1xf32>
    %cst_21 = arith.constant dense<0.000000e+00> : vector<1xf32>
    %20 = vector.multi_reduction <add>, %19, %cst_21 [1, 2] : vector<1x32x1xf32> to vector<1xf32>
    %21 = vector.shape_cast %20 : vector<1xf32> to vector<1x1x1xf32>
    %22 = vector.extract %21[0, 0, 0] : f32 from vector<1x1x1xf32>
    %23 = vector.shape_cast %18 : vector<32x1xf32> to vector<1x32x1xf32>
    %cst_22 = arith.constant dense<0.000000e+00> : vector<1xf32>
    %24 = vector.multi_reduction <add>, %23, %cst_22 [1, 2] : vector<1x32x1xf32> to vector<1xf32>
    %25 = vector.shape_cast %24 : vector<1xf32> to vector<1x1x1xf32>
    %26 = vector.extract %25[0, 0, 0] : f32 from vector<1x1x1xf32>
    %27 = arith.mulf %11, %11 : vector<32x256xf32>
    %28 = vector.shape_cast %27 : vector<32x256xf32> to vector<1x32x256xf32>
    %cst_23 = arith.constant dense<0.000000e+00> : vector<1xf32>
    %29 = vector.multi_reduction <add>, %28, %cst_23 [1, 2] : vector<1x32x256xf32> to vector<1xf32>
    %30 = vector.shape_cast %29 : vector<1xf32> to vector<1x1x1xf32>
    %31 = vector.extract %30[0, 0, 0] : f32 from vector<1x1x1xf32>
    %32 = arith.mulf %13, %13 : vector<32x256xf32>
    %33 = vector.shape_cast %32 : vector<32x256xf32> to vector<1x32x256xf32>
    %cst_24 = arith.constant dense<0.000000e+00> : vector<1xf32>
    %34 = vector.multi_reduction <add>, %33, %cst_24 [1, 2] : vector<1x32x256xf32> to vector<1xf32>
    %35 = vector.shape_cast %34 : vector<1xf32> to vector<1x1x1xf32>
    %36 = vector.extract %35[0, 0, 0] : f32 from vector<1x1x1xf32>
    %cst_25 = arith.constant dense<0.000000e+00> : vector<32x512xf32>
    %37 = tpu.matmul %3, %14, %cst_25 {dimension_numbers = #tpu.dot_dimension_numbers<[1], [0], [0], [1], [0, 0, 1, 1], [], []>} : vector<32x32xf32>, vector<32x512xf32>, vector<32x512xf32> -> vector<32x512xf32>
    %38 = vector.broadcast %1 : vector<32x1xf32> to vector<32x512xf32>
    %39 = arith.addf %37, %38 : vector<32x512xf32>
    %cst_26 = arith.constant dense<0.000000e+00> : vector<1x512xf32>
    %40 = tpu.matmul %0, %14, %cst_26 {dimension_numbers = #tpu.dot_dimension_numbers<[1], [0], [0], [1], [0, 0, 1, 1], [], []>} : vector<1x32xf32>, vector<32x512xf32>, vector<1x512xf32> -> vector<1x512xf32>
    %41 = vector.extract_strided_slice %40 {offsets = [0, 0], sizes = [1, 256], strides = [1, 1]} : vector<1x512xf32> to vector<1x256xf32>
    %cst_27 = arith.constant dense<0xFF800000> : vector<1xf32>
    %42 = vector.multi_reduction <maximumf>, %41, %cst_27 [1] : vector<1x256xf32> to vector<1xf32>
    %43 = vector.shape_cast %42 : vector<1xf32> to vector<1x1xf32>
    %44 = vector.broadcast %43 : vector<1x1xf32> to vector<1x256xf32>
    %45 = arith.subf %41, %44 : vector<1x256xf32>
    %46 = math.exp %45 : vector<1x256xf32>
    %cst_28 = arith.constant dense<0.000000e+00> : vector<1xf32>
    %47 = vector.multi_reduction <add>, %46, %cst_28 [1] : vector<1x256xf32> to vector<1xf32>
    %48 = vector.shape_cast %47 : vector<1xf32> to vector<1x1xf32>
    %49 = tpu.reciprocal %48 : vector<1x1xf32> -> vector<1x1xf32>
    %50 = vector.broadcast %49 : vector<1x1xf32> to vector<1x256xf32>
    %51 = arith.mulf %46, %50 : vector<1x256xf32>
    %52 = vector.extract_strided_slice %40 {offsets = [0, 256], sizes = [1, 256], strides = [1, 1]} : vector<1x512xf32> to vector<1x256xf32>
    %cst_29 = arith.constant dense<0xFF800000> : vector<1xf32>
    %53 = vector.multi_reduction <maximumf>, %52, %cst_29 [1] : vector<1x256xf32> to vector<1xf32>
    %54 = vector.shape_cast %53 : vector<1xf32> to vector<1x1xf32>
    %55 = vector.broadcast %54 : vector<1x1xf32> to vector<1x256xf32>
    %56 = arith.subf %52, %55 : vector<1x256xf32>
    %57 = math.exp %56 : vector<1x256xf32>
    %cst_30 = arith.constant dense<0.000000e+00> : vector<1xf32>
    %58 = vector.multi_reduction <add>, %57, %cst_30 [1] : vector<1x256xf32> to vector<1xf32>
    %59 = vector.shape_cast %58 : vector<1xf32> to vector<1x1xf32>
    %60 = tpu.reciprocal %59 : vector<1x1xf32> -> vector<1x1xf32>
    %61 = vector.broadcast %60 : vector<1x1xf32> to vector<1x256xf32>
    %62 = arith.mulf %57, %61 : vector<1x256xf32>
    %63 = vector.extract_strided_slice %39 {offsets = [0, 0], sizes = [32, 256], strides = [1, 1]} : vector<32x512xf32> to vector<32x256xf32>
    %64 = vector.broadcast %51 : vector<1x256xf32> to vector<32x256xf32>
    %65 = arith.mulf %63, %64 : vector<32x256xf32>
    %cst_31 = arith.constant dense<0.000000e+00> : vector<32xf32>
    %66 = vector.multi_reduction <add>, %65, %cst_31 [1] : vector<32x256xf32> to vector<32xf32>
    %67 = vector.shape_cast %66 : vector<32xf32> to vector<32x1xf32>
    %68 = vector.shape_cast %67 : vector<32x1xf32> to vector<1x32x1xf32>
    %cst_32 = arith.constant dense<0.000000e+00> : vector<1xf32>
    %69 = vector.multi_reduction <add>, %68, %cst_32 [1, 2] : vector<1x32x1xf32> to vector<1xf32>
    %70 = vector.shape_cast %69 : vector<1xf32> to vector<1x1x1xf32>
    %71 = vector.extract %70[0, 0, 0] : f32 from vector<1x1x1xf32>
    %cst_33 = arith.constant 2.560000e+02 : f32
    %72 = arith.mulf %cst_33, %71 : f32
    %73 = arith.addf %22, %72 : f32
    %74 = arith.mulf %67, %16 : vector<32x1xf32>
    %75 = vector.shape_cast %74 : vector<32x1xf32> to vector<1x32x1xf32>
    %cst_34 = arith.constant dense<0.000000e+00> : vector<1xf32>
    %76 = vector.multi_reduction <add>, %75, %cst_34 [1, 2] : vector<1x32x1xf32> to vector<1xf32>
    %77 = vector.shape_cast %76 : vector<1xf32> to vector<1x1x1xf32>
    %78 = vector.extract %77[0, 0, 0] : f32 from vector<1x1x1xf32>
    %cst_35 = arith.constant 2.000000e+00 : f32
    %79 = arith.mulf %cst_35, %78 : f32
    %80 = arith.addf %31, %79 : f32
    %81 = arith.mulf %67, %67 : vector<32x1xf32>
    %82 = vector.shape_cast %81 : vector<32x1xf32> to vector<1x32x1xf32>
    %cst_36 = arith.constant dense<0.000000e+00> : vector<1xf32>
    %83 = vector.multi_reduction <add>, %82, %cst_36 [1, 2] : vector<1x32x1xf32> to vector<1xf32>
    %84 = vector.shape_cast %83 : vector<1xf32> to vector<1x1x1xf32>
    %85 = vector.extract %84[0, 0, 0] : f32 from vector<1x1x1xf32>
    %cst_37 = arith.constant 2.560000e+02 : f32
    %86 = arith.mulf %cst_37, %85 : f32
    %87 = arith.addf %80, %86 : f32
    %cst_38 = arith.constant 8.192000e+03 : f32
    %88 = arith.divf %73, %cst_38 : f32
    %cst_39 = arith.constant 8.192000e+03 : f32
    %89 = arith.divf %87, %cst_39 : f32
    %90 = arith.mulf %88, %88 : f32
    %91 = arith.subf %89, %90 : f32
    %cst_40 = arith.constant 9.99999974E-6 : f32
    %92 = arith.addf %91, %cst_40 : f32
    %93 = math.rsqrt %92 : f32
    %94 = vector.broadcast %67 : vector<32x1xf32> to vector<32x256xf32>
    %95 = arith.addf %11, %94 : vector<32x256xf32>
    %96 = vector.broadcast %88 : f32 to vector<32x256xf32>
    %97 = arith.subf %95, %96 : vector<32x256xf32>
    %98 = vector.broadcast %93 : f32 to vector<32x256xf32>
    %99 = arith.mulf %98, %7 : vector<32x256xf32>
    %100 = arith.mulf %97, %99 : vector<32x256xf32>
    %101 = vector.extract_strided_slice %39 {offsets = [0, 256], sizes = [32, 256], strides = [1, 1]} : vector<32x512xf32> to vector<32x256xf32>
    %102 = vector.broadcast %62 : vector<1x256xf32> to vector<32x256xf32>
    %103 = arith.mulf %101, %102 : vector<32x256xf32>
    %cst_41 = arith.constant dense<0.000000e+00> : vector<32xf32>
    %104 = vector.multi_reduction <add>, %103, %cst_41 [1] : vector<32x256xf32> to vector<32xf32>
    %105 = vector.shape_cast %104 : vector<32xf32> to vector<32x1xf32>
    %106 = vector.shape_cast %105 : vector<32x1xf32> to vector<1x32x1xf32>
    %cst_42 = arith.constant dense<0.000000e+00> : vector<1xf32>
    %107 = vector.multi_reduction <add>, %106, %cst_42 [1, 2] : vector<1x32x1xf32> to vector<1xf32>
    %108 = vector.shape_cast %107 : vector<1xf32> to vector<1x1x1xf32>
    %109 = vector.extract %108[0, 0, 0] : f32 from vector<1x1x1xf32>
    %cst_43 = arith.constant 2.560000e+02 : f32
    %110 = arith.mulf %cst_43, %109 : f32
    %111 = arith.addf %26, %110 : f32
    %112 = arith.mulf %105, %18 : vector<32x1xf32>
    %113 = vector.shape_cast %112 : vector<32x1xf32> to vector<1x32x1xf32>
    %cst_44 = arith.constant dense<0.000000e+00> : vector<1xf32>
    %114 = vector.multi_reduction <add>, %113, %cst_44 [1, 2] : vector<1x32x1xf32> to vector<1xf32>
    %115 = vector.shape_cast %114 : vector<1xf32> to vector<1x1x1xf32>
    %116 = vector.extract %115[0, 0, 0] : f32 from vector<1x1x1xf32>
    %cst_45 = arith.constant 2.000000e+00 : f32
    %117 = arith.mulf %cst_45, %116 : f32
    %118 = arith.addf %36, %117 : f32
    %119 = arith.mulf %105, %105 : vector<32x1xf32>
    %120 = vector.shape_cast %119 : vector<32x1xf32> to vector<1x32x1xf32>
    %cst_46 = arith.constant dense<0.000000e+00> : vector<1xf32>
    %121 = vector.multi_reduction <add>, %120, %cst_46 [1, 2] : vector<1x32x1xf32> to vector<1xf32>
    %122 = vector.shape_cast %121 : vector<1xf32> to vector<1x1x1xf32>
    %123 = vector.extract %122[0, 0, 0] : f32 from vector<1x1x1xf32>
    %cst_47 = arith.constant 2.560000e+02 : f32
    %124 = arith.mulf %cst_47, %123 : f32
    %125 = arith.addf %118, %124 : f32
    %cst_48 = arith.constant 8.192000e+03 : f32
    %126 = arith.divf %111, %cst_48 : f32
    %cst_49 = arith.constant 8.192000e+03 : f32
    %127 = arith.divf %125, %cst_49 : f32
    %128 = arith.mulf %126, %126 : f32
    %129 = arith.subf %127, %128 : f32
    %cst_50 = arith.constant 9.99999974E-6 : f32
    %130 = arith.addf %129, %cst_50 : f32
    %131 = math.rsqrt %130 : f32
    %132 = vector.broadcast %105 : vector<32x1xf32> to vector<32x256xf32>
    %133 = arith.addf %13, %132 : vector<32x256xf32>
    %134 = vector.broadcast %126 : f32 to vector<32x256xf32>
    %135 = arith.subf %133, %134 : vector<32x256xf32>
    %136 = vector.broadcast %131 : f32 to vector<32x256xf32>
    %137 = arith.mulf %136, %7 : vector<32x256xf32>
    %138 = arith.mulf %135, %137 : vector<32x256xf32>
    %139 = tpu.concatenate %100, %138 in 1 : vector<32x256xf32>, vector<32x256xf32> -> vector<32x512xf32>
    %cst_51 = arith.constant dense<0.000000e+00> : vector<32x512xf32>
    %140 = tpu.matmul %5, %139, %cst_51 {dimension_numbers = #tpu.dot_dimension_numbers<[1], [0], [0], [1], [0, 0, 1, 1], [], []>} : vector<32x32xf32>, vector<32x512xf32>, vector<32x512xf32> -> vector<32x512xf32>
    %141 = vector.extract_strided_slice %140 {offsets = [0, 0], sizes = [32, 256], strides = [1, 1]} : vector<32x512xf32> to vector<32x256xf32>
    %142 = arith.addf %141, %9 : vector<32x256xf32>
    %cst_52 = arith.constant 0.000000e+00 : f32
    %143 = vector.broadcast %cst_52 : f32 to vector<32x256xf32>
    %144 = arith.maximumf %142, %143 : vector<32x256xf32>
    %c0_53 = arith.constant 0 : index
    %c0_54 = arith.constant 0 : index
    %c0_55 = arith.constant 0 : index
    %145 = vector.load %arg6[%c0_53, %c0_54, %c0_55] : memref<2x32x256xf32, #tpu.memory_space<vmem>>, vector<1x32x256xf32>
    %146 = vector.shape_cast %145 : vector<1x32x256xf32> to vector<32x256xf32>
    %147 = vector.shape_cast %144 : vector<32x256xf32> to vector<1x32x256xf32>
    tpu.vector_store %arg6[%c0_53, %c0_54, %c0_55], %147 {strides = array<i32>} : memref<2x32x256xf32, #tpu.memory_space<vmem>>, vector<1x32x256xf32>,
    %148 = vector.extract_strided_slice %140 {offsets = [0, 256], sizes = [32, 256], strides = [1, 1]} : vector<32x512xf32> to vector<32x256xf32>
    %149 = arith.addf %148, %9 : vector<32x256xf32>
    %cst_56 = arith.constant 0.000000e+00 : f32
    %150 = vector.broadcast %cst_56 : f32 to vector<32x256xf32>
    %151 = arith.maximumf %149, %150 : vector<32x256xf32>
    %c1_57 = arith.constant 1 : index
    %c0_58 = arith.constant 0 : index
    %c0_59 = arith.constant 0 : index
    %152 = vector.load %arg6[%c1_57, %c0_58, %c0_59] : memref<2x32x256xf32, #tpu.memory_space<vmem>>, vector<1x32x256xf32>
    %153 = vector.shape_cast %152 : vector<1x32x256xf32> to vector<32x256xf32>
    %154 = vector.shape_cast %151 : vector<32x256xf32> to vector<1x32x256xf32>
    tpu.vector_store %arg6[%c1_57, %c0_58, %c0_59], %154 {strides = array<i32>} : memref<2x32x256xf32, #tpu.memory_space<vmem>>, vector<1x32x256xf32>,
    return
  }
  func.func @transform_0(%arg0: i32) -> (i32, i32, i32) {
    %c0_i32 = arith.constant 0 : i32
    %c0_i32_0 = arith.constant 0 : i32
    %c0_i32_1 = arith.constant 0 : i32
    %c0_i32_2 = arith.constant 0 : i32
    return %c0_i32, %c0_i32_0, %c0_i32_1 : i32, i32, i32
  }
  func.func @transform_1(%arg0: i32) -> (i32, i32) {
    %c0_i32 = arith.constant 0 : i32
    %c0_i32_0 = arith.constant 0 : i32
    %c0_i32_1 = arith.constant 0 : i32
    return %c0_i32, %c0_i32_0 : i32, i32
  }
  func.func @transform_2(%arg0: i32) -> (i32, i32) {
    %c0_i32 = arith.constant 0 : i32
    %c0_i32_0 = arith.constant 0 : i32
    %c0_i32_1 = arith.constant 0 : i32
    return %c0_i32, %c0_i32_0 : i32, i32
  }
  func.func @transform_3(%arg0: i32) -> (i32, i32, i32) {
    %c0_i32 = arith.constant 0 : i32
    %c0_i32_0 = arith.constant 0 : i32
    %c0_i32_1 = arith.constant 0 : i32
    %c0_i32_2 = arith.constant 0 : i32
    return %c0_i32, %c0_i32_0, %c0_i32_1 : i32, i32, i32
  }
  func.func @transform_4(%arg0: i32) -> (i32, i32, i32) {
    %c0_i32 = arith.constant 0 : i32
    %c0_i32_0 = arith.constant 0 : i32
    %c0_i32_1 = arith.constant 0 : i32
    %c0_i32_2 = arith.constant 0 : i32
    return %c0_i32, %c0_i32_0, %c0_i32_1 : i32, i32, i32
  }
  func.func @transform_5(%arg0: i32) -> (i32, i32, i32) {
    %c0_i32 = arith.constant 0 : i32
    %c0_i32_0 = arith.constant 0 : i32
    %c0_i32_1 = arith.constant 0 : i32
    %c0_i32_2 = arith.constant 0 : i32
    return %c0_i32, %c0_i32_0, %c0_i32_1 : i32, i32, i32
  }
}

</mosaic_0001>

<bundles_post_ra>
// kernel: cross_attention_layer.1
= control target key start
LH: loop header
LB: loop body
LE: loop exit
PB: predicated region body
PF: predicated region fallthrough
CT: control target
= control target key end

     0   :  { %v1072_v3 = vmov 0   ;;  %vm193_vm0 = vcmask 261120   ;;  %vm405_vm1 = vcmask 1040384   ;;  %vm92_vm6 = vcmask 7168   ;;  %s1753_s0 = inlined_call_operand.vmem [shape: f32[2,32,256], index: 0, kind: input, shape index: {}]   ;;  %s1754_s2 = inlined_call_operand.vmem [shape: f32[32,1], index: 2, kind: input, shape index: {}]   ;;  %s1755_s3 = inlined_call_operand.vmem [shape: f32[2,32,32], index: 3, kind: input, shape index: {}]   ;;  %s1756_s1 = inlined_call_operand.vmem [shape: f32[1,32], index: 1, kind: input, shape index: {}]   ;;  %s1757_s4 = inlined_call_operand.vmem [shape: f32[2,32,256], index: 4, kind: input, shape index: {}]   ;;  %s1758_s5 = inlined_call_operand.vmem [shape: f32[2,32,256], index: 5, kind: output, shape index: {}]  }
   0x1   :  { %v1107_v0 = vld [vmem:[%s1753_s0 + $0x30] sm:$0xff]  ;;  %v1112_v1 = vld [vmem:[%s1753_s0 + $0x38] sm:$0xff]  ;;  %v1117_v2 = vld [vmem:[%s1753_s0 + $0x20] sm:$0xff]  ;;  %1045 = vset.pattern.permute.xlu1 %v1072_v3  ;;  %1046 = vset.pattern.permute.xlu2 %v1072_v3 }
   0x2   :  { %218 = vmatpush.msra.mxu0 %v1107_v0  ;;  %247 = vmatpush.msra.mxu1 %v1112_v1  ;;  %v1124_v4 = vld [vmem:[%s1753_s0 + $0x28] sm:$0xff]  ;;  %v1129_v5 = vld [vmem:[%s1753_s0 + $0x10] sm:$0xff]  ;;  %v1134_v6 = vld [vmem:[%s1753_s0 + $0x18] sm:$0xff]  ;;  %v77_v48 = vadd.f32 %v1112_v1, %v1107_v0 }
   0x3   :  { %1047 = vset.pattern.permute.xlu0 %v1072_v3  ;;  %v21_v7 = vld [vmem:[%s1754_s2] sm:$0xff]  ;;  %v1149_v9 = vld [vmem:[%s1753_s0 + $0x8] sm:$0xff]  ;;  %v23_v11 = vld [vmem:[%s1754_s2 + $0x10] sm:$0xff]  ;;  %v71_v44 = vadd.f32 %v1134_v6, %v1129_v5 }
   0x4   :  { %219 = vmatpush.msra.mxu0 %v1117_v2  ;;  %248 = vmatpush.msra.mxu1 %v1124_v4  ;;  %v1144_v8 = vld [vmem:[%s1753_s0] sm:$0xff]  ;;  %v22_v12 = vld [vmem:[%s1754_s2 + $0x8] sm:$0xff]  ;;  %v24_v14 = vld [vmem:[%s1754_s2 + $0x18] sm:$0xff] }
   0x5   :  { %175 = vperm.xlu1 %1045, %v21_v7   ;;  %v25_v10 = vld [vmem:[%s1755_s3] sm:$0xff]  ;;  %185 = vperm.xlu2 %1046, %v23_v11   ;;  %v26_v13 = vld [vmem:[%s1755_s3 + $0x8] sm:$0xff]  ;;  %v27_v15 = vld [vmem:[%s1755_s3 + $0x10] sm:$0xff]  ;;  %v68_v43 = vadd.f32 %v1149_v9, %v1144_v8  ;;  %v74_v7 = vadd.f32 %v1124_v4, %v1117_v2 }
   0x6   :  { %220 = vmatpush.msra.mxu0 %v1129_v5  ;;  %249 = vmatpush.msra.mxu1 %v1134_v6  ;;  %v28_v16 = vld [vmem:[%s1755_s3 + $0x18] sm:$0xff]  ;;  %v20_v17 = vld [vmem:[%s1756_s1] sm:$0x1]  ;;  %v1200_v18 = vld [vmem:[%s1753_s0 + $0x70] sm:$0xff] }
   0x7   :  { %v1205_v19 = vld [vmem:[%s1753_s0 + $0x78] sm:$0xff]  ;;  %276 = vmatpush.msra.mxu2 %v1200_v18  ;;  %v1212_v20 = vld [vmem:[%s1753_s0 + $0x60] sm:$0xff]  ;;  %v1217_v21 = vld [vmem:[%s1753_s0 + $0x68] sm:$0xff] }
   0x8   :  { %221 = vmatpush.msra.mxu0 %v1144_v8  ;;  %250 = vmatpush.msra.mxu1 %v1149_v9  ;;  %v1222_v22 = vld [vmem:[%s1753_s0 + $0x50] sm:$0xff]  ;;  %v1229_v23 = vld [vmem:[%s1753_s0 + $0x58] sm:$0xff]  ;;  %v1234_v24 = vld [vmem:[%s1753_s0 + $0x40] sm:$0xff] }
   0x9   :  { %973 = vmatmul.msk.f32.vlgmr.msra.gmra.mxu0 %vm193_vm0, %v25_v10  ;;  %977 = vmatmul.msk.f32.vlgmr.msra.gmra.mxu1 %vm193_vm0, %v25_v10  ;;  %v1239_v25 = vld [vmem:[%s1753_s0 + $0x48] sm:$0xff]  ;;  %v83_v11 = vadd.f32 %v1229_v23, %v1222_v22 }
   0xa   :  { %337 = vmatpush.msrb.mxu0 %v1107_v0  ;;  %357 = vmatpush.msrb.mxu1 %v1112_v1 }
   0xb   :  { %305 = vmatpush.msra.mxu3 %v1205_v19  ;;  %277 = vmatpush.msra.mxu2 %v1212_v20 }
   0xc   :  { %338 = vmatpush.msrb.mxu0 %v1117_v2  ;;  %358 = vmatpush.msrb.mxu1 %v1124_v4 }
   0xd   :  { %180 = vperm.xlu1 %1045, %v22_v12   ;;  %190 = vperm.xlu2 %1046, %v24_v14  }
   0xe   :  { %339 = vmatpush.msrb.mxu0 %v1129_v5  ;;  %359 = vmatpush.msrb.mxu1 %v1134_v6 }
   0xf   :  { %306 = vmatpush.msra.mxu3 %v1217_v21  ;;  %278 = vmatpush.msra.mxu2 %v1222_v22 }
  0x10   :  { %340 = vmatpush.msrb.mxu0 %v1144_v8  ;;  %360 = vmatpush.msrb.mxu1 %v1149_v9 }
  0x11   :  { %974 = vmatmul.msk.f32.gmra.mxu0 %vm193_vm0, %v26_v13  ;;  %978 = vmatmul.msk.f32.gmra.mxu1 %vm193_vm0, %v26_v13 }
  0x12   :  { %307 = vmatpush.msra.mxu3 %v1229_v23  ;;  %279 = vmatpush.msra.mxu2 %v1234_v24 }
  0x13   :  { %981 = vmatmul.msk.f32.vlgmr.msra.gmra.mxu2 %vm193_vm0, %v25_v10 }
  0x14   :  { %308 = vmatpush.msra.mxu3 %v1239_v25  ;;  %377 = vmatpush.msrb.mxu2 %v1200_v18 }
  0x15   :  { %985 = vmatmul.msk.f32.vlgmr.msra.gmra.mxu3 %vm193_vm0, %v25_v10  ;;  %v80_v10 = vadd.f32 %v1239_v25, %v1234_v24 }
  0x16   :  { %397 = vmatpush.msrb.mxu3 %v1205_v19  ;;  %378 = vmatpush.msrb.mxu2 %v1212_v20 }
  0x18   :  { %398 = vmatpush.msrb.mxu3 %v1217_v21  ;;  %379 = vmatpush.msrb.mxu2 %v1222_v22 }
  0x19   :  { %975 = vmatmul.msk.f32.gmra.mxu0 %vm193_vm0, %v27_v15  ;;  %979 = vmatmul.msk.f32.gmra.mxu1 %vm193_vm0, %v27_v15 }
  0x1a   :  { %399 = vmatpush.msrb.mxu3 %v1229_v23  ;;  %380 = vmatpush.msrb.mxu2 %v1234_v24 }
  0x1b   :  { %982 = vmatmul.msk.f32.gmra.mxu2 %vm193_vm0, %v26_v13 }
  0x1c   :  { %400 = vmatpush.msrb.mxu3 %v1239_v25 }
  0x1d   :  { %986 = vmatmul.msk.f32.gmra.mxu3 %vm193_vm0, %v26_v13 }
  0x21   :  { %976 = vmatmul.msk.f32.gmra.mxu0 %vm193_vm0, %v28_v16  ;;  %980 = vmatmul.msk.f32.gmra.mxu1 %vm193_vm0, %v28_v16 }
  0x23   :  { %983 = vmatmul.msk.f32.gmra.mxu2 %vm193_vm0, %v27_v15 }
  0x25   :  { %987 = vmatmul.msk.f32.gmra.mxu3 %vm193_vm0, %v27_v15 }
  0x29   :  { %989 = vmatmul.msk.f32.vlgmr.msrb.gmra.mxu0 %vm193_vm0, %v20_v17  ;;  %990 = vmatmul.msk.f32.vlgmr.msrb.gmra.mxu1 %vm193_vm0, %v20_v17 }
  0x2b   :  { %984 = vmatmul.msk.f32.gmra.mxu2 %vm193_vm0, %v28_v16 }
  0x2d   :  { %988 = vmatmul.msk.f32.gmra.mxu3 %vm193_vm0, %v28_v16 }
  0x33   :  { %991 = vmatmul.msk.f32.vlgmr.msrb.gmra.mxu2 %vm193_vm0, %v20_v17 }
  0x35   :  { %992 = vmatmul.msk.f32.vlgmr.msrb.gmra.mxu3 %vm193_vm0, %v20_v17 }
  0x36   :  { %72 = vadd.xlane.f32.xlu2 %v71_v44 }
  0x37   :  { %69 = vadd.xlane.f32.xlu1 %v68_v43 }
  0x3f   :  { %78 = vadd.xlane.f32.xlu1 %v77_v48 }
  0x5f   :  { %v1321_v15 = vpop.permute.xlu2 %185 }
  0x77   :  { %v1319_v14 = vpop.permute.xlu1 %175 }
  0x7f   :  { %v1325_v48 = vpop.permute.xlu1 %180 }
  0x86   :  { %v1261_v26 = vpop.f32.mrf.mxu0  ;;  %v1263_v27 = vpop.f32.mrf.mxu1 }
  0x8e   :  { %v1267_v28 = vpop.f32.mrf.mxu0  ;;  %v1269_v29 = vpop.f32.mrf.mxu1 }
  0x96   :  { %v1271_v30 = vpop.f32.mrf.mxu0  ;;  %v1273_v31 = vpop.f32.mrf.mxu1 }
  0x97   :  { %v1281_v39 = vpop.f32.mrf.mxu2 }
  0x98   :  { %v1283_v40 = vpop.f32.mrf.mxu3 }
  0x9e   :  { %v1275_v32 = vpop.f32.mrf.mxu0  ;;  %v1277_v33 = vpop.f32.mrf.mxu1 }
  0x9f   :  { %v1285_v41 = vpop.f32.mrf.mxu2 }
  0xa0   :  { %v1287_v42 = vpop.f32.mrf.mxu3 }
  0xa6   :  { %v342_v34 = vpop.f32.mrf.mxu0  ;;  %v362_v35 = vpop.f32.mrf.mxu1 }
  0xa7   :  { %v406_v36 = vsel %vm405_vm1, %v342_v34, -inf  ;;  %v407_v37 = vsel %vm405_vm1, %v362_v35, -inf  ;;  %v1293_v45 = vpop.f32.mrf.mxu2 }
  0xa8   :  { %v408_v38 = vmax.f32 %v406_v36, %v407_v37  ;;  %v1295_v46 = vpop.f32.mrf.mxu3 }
  0xaa   :  { %409 = vmax.xlane.f32.xlu0 %v408_v38 }
  0xaf   :  { %v1299_v53 = vpop.f32.mrf.mxu2 }
  0xb0   :  { %v1301_v54 = vpop.f32.mrf.mxu3 }
  0xb7   :  { %v1305_v60 = vpop.f32.mrf.mxu2 }
  0xb8   :  { %v1307_v61 = vpop.f32.mrf.mxu3  ;;  %v438_v62 = vsel %vm405_vm1, %v1305_v60, -inf }
  0xb9   :  { %v439_v63 = vsel %vm405_vm1, %v1307_v61, -inf }
  0xba   :  { %v440_v3 = vmax.f32 %v438_v62, %v439_v63 }
 0x11d   :  { %v410_v47 = vpop.xlane.xlu0 %409 }
 0x11e   :  { %v411_v49 = vsub.f32 %v342_v34, %v410_v47  ;;  %v412_v50 = vsub.f32 %v362_v35, %v410_v47  ;;  %v89_v34 = vadd.f32 %v1205_v19, %v1200_v18 }
 0x120   :  { %v413_v51 = vmul.f32 1.442695, %v411_v49  ;;  %v415_v52 = vmul.f32 1.442695, %v412_v50  ;;  %90 = vadd.xlane.f32.xlu1 %v89_v34  ;;  %v1327_v49 = vpop.permute.xlu2 %190 }
 0x122   :  { %1048 = vpow2.f32 %v413_v51 }
 0x123   :  { %1050 = vpow2.f32 %v415_v52  ;;  %v224_v52 = vadd.f32 %v1261_v26, %v1319_v14  ;;  %v233_v26 = vadd.f32 %v1275_v32, %v1327_v49 }
 0x128   :  { %v1049_v55 = vpop.eup %1048 }
 0x129   :  { %v1051_v56 = vpop.eup %1050  ;;  %v417_v57 = vsel %vm405_vm1, %v1049_v55, 0.0 }
 0x12a   :  { %v418_v58 = vsel %vm405_vm1, %v1051_v56, 0.0 }
 0x12b   :  { %v419_v59 = vadd.f32 %v418_v58, %v417_v57  ;;  %v253_v57 = vadd.f32 %v1263_v27, %v1319_v14  ;;  %v230_v58 = vadd.f32 %v1271_v30, %v1321_v15  ;;  %v262_v27 = vadd.f32 %v1277_v33, %v1327_v49 }
 0x12d   :  { %420 = vadd.xlane.f32.xlu0 %v419_v59  ;;  %v259_v59 = vadd.f32 %v1273_v31, %v1321_v15 }
 0x135   :  { %441 = vmax.xlane.f32.xlu0 %v440_v3  ;;  %v227_v3 = vadd.f32 %v1267_v28, %v1325_v48 }
 0x13d   :  { %75 = vadd.xlane.f32.xlu0 %v74_v7 }
 0x145   :  { %81 = vadd.xlane.f32.xlu0 %v80_v10 }
 0x14d   :  { %84 = vadd.xlane.f32.xlu0 %v83_v11 }
 0x1a0   :  { %v421_v12 = vpop.xlane.xlu0 %420 }
 0x1a1   :  { %1052 = vrcp.f32 %v421_v12  ;;  %v433_v35 = vand.u32 2147483648, %v421_v12  ;;  %v431_v37 = vand.u32 2147483647, %v421_v12  ;;  %vm427_vm3 = vweird.f32 %v421_v12 }
 0x1a3   :  { %v434_v43 = vor.u32 1.1754944e-38, %v433_v35  ;;  %vm432_vm5 = vcmp.eq.f32.partialorder %v431_v37, 8.507059e+37  ;;  %v86_v37 = vadd.f32 %v1217_v21, %v1212_v20 }
 0x1a7   :  { %v1053_v13 = vpop.eup %1052 }
 0x1a8   :  { %v423_v16 = vmul.f32 %v1053_v13, %v421_v12  ;;  %vm428_vm2 = vweird.f32 %v1053_v13 }
 0x1a9   :  { %vm429_vm4 = vmor %vm427_vm3, %vm428_vm2 }
 0x1aa   :  { %v424_v17 = vsub.f32 1.0, %v423_v16  ;;  %v442_v16 = vpop.xlane.xlu0 %441 }
 0x1ab   :  { %v444_v32 = vsub.f32 %v1307_v61, %v442_v16 }
 0x1ac   :  { %v425_v36 = vmul.f32 %v1053_v13, %v424_v17 }
 0x1ae   :  { %v426_v38 = vadd.f32 %v1053_v13, %v425_v36  ;;  %v447_v36 = vmul.f32 1.442695, %v444_v32 }
 0x1b0   :  { %v430_v44 = vsel %vm429_vm4, %v1053_v13, %v426_v38  ;;  %v70_v38 = vpop.xlane.xlu1 %69 }
 0x1b1   :  { %v435_v47 = vsel %vm432_vm5, %v434_v43, %v430_v44  ;;  %v73_v43 = vpop.xlane.xlu2 %72 }
 0x1b2   :  { %v436_v50 = vmul.f32 %v1049_v55, %v435_v47  ;;  %v437_v51 = vmul.f32 %v1051_v56, %v435_v47  ;;  %v256_v55 = vadd.f32 %v1269_v29, %v1325_v48  ;;  %v443_v29 = vsub.f32 %v1305_v60, %v442_v16 }
 0x1b3   :  { %v93_v60 = vsel %vm92_vm6, %v70_v38, 0.0  ;;  %v94_v61 = vsel %vm92_vm6, %v73_v43, 0.0  ;;  %v152_v16 = vmul.f32 %v1229_v23, %v1229_v23  ;;  %v131_v23 = vmul.f32 %v1107_v0, %v1107_v0 }
 0x1b4   :  { %v470_v62 = vperm.slane %v436_v50, 0  ;;  %v471_v63 = vperm.slane %v437_v51, 0  ;;  %v445_v33 = vmul.f32 1.442695, %v443_v29 }
 0x1b6   :  { %v476_v56 = vmul.f32 %v470_v62, %v230_v58  ;;  %v477_v7 = vmul.f32 %v471_v63, %v259_v59  ;;  %v472_v30 = vmul.f32 %v470_v62, %v224_v52  ;;  %v473_v10 = vmul.f32 %v471_v63, %v253_v57  ;;  %v76_v57 = vpop.xlane.xlu0 %75 }
 0x1b7   :  { %v478_v11 = vmul.f32 %v470_v62, %v233_v26  ;;  %v479_v31 = vmul.f32 %v471_v63, %v262_v27  ;;  %v474_v12 = vmul.f32 %v470_v62, %v227_v3  ;;  %v475_v13 = vmul.f32 %v471_v63, %v256_v55 }
 0x1b8   :  { %v486_v17 = vadd.f32 %v477_v7, %v476_v56  ;;  %v480_v28 = vadd.f32 %v473_v10, %v472_v30  ;;  %1054 = vpow2.f32 %v445_v33  ;;  %v95_v52 = vadd.f32 %v94_v61, %v93_v60  ;;  %v79_v62 = vpop.xlane.xlu1 %78 }
 0x1b9   :  { %v489_v34 = vadd.f32 %v479_v31, %v478_v11  ;;  %v483_v35 = vadd.f32 %v475_v13, %v474_v12  ;;  %1056 = vpow2.f32 %v447_v36  ;;  %v96_v58 = vsel %vm92_vm6, %v76_v57, 0.0 }
 0x1ba   :  { %487 = vadd.xlane.f32.xlu2 %v486_v17  ;;  %481 = vadd.xlane.f32.xlu0 %v480_v28  ;;  %v97_v63 = vadd.f32 %v96_v58, %v95_v52  ;;  %v98_v3 = vsel %vm92_vm6, %v79_v62, 0.0  ;;  %v125_v26 = vmul.f32 %v1144_v8, %v1144_v8  ;;  %v126_v27 = vmul.f32 %v1149_v9, %v1149_v9 }
 0x1bb   :  { %v149_v56 = vmul.f32 %v1234_v24, %v1234_v24  ;;  %v150_v7 = vmul.f32 %v1239_v25, %v1239_v25  ;;  %v127_v30 = vmul.f32 %v1129_v5, %v1129_v5  ;;  %v151_v10 = vmul.f32 %v1222_v22, %v1222_v22 }
 0x1bc   :  { %v99_v55 = vadd.f32 %v98_v3, %v97_v63  ;;  %v133_v11 = vadd.f32 %v126_v27, %v125_v26  ;;  %v128_v12 = vmul.f32 %v1134_v6, %v1134_v6  ;;  %v129_v28 = vmul.f32 %v1117_v2, %v1117_v2 }
 0x1bd   :  { %v157_v31 = vadd.f32 %v150_v7, %v149_v56  ;;  %v130_v22 = vmul.f32 %v1124_v4, %v1124_v4  ;;  %v154_v33 = vmul.f32 %v1217_v21, %v1217_v21  ;;  %v155_v60 = vmul.f32 %v1200_v18, %v1200_v18 }
 0x1be   :  { %v1349_v44 = vpop.eup %1054  ;;  %v134_v13 = vadd.f32 %v133_v11, %v127_v30  ;;  %v1393_v21 = vpop.xlane.xlu0 %81 }
 0x1bf   :  { %v1351_v47 = vpop.eup %1056  ;;  %v449_v50 = vsel %vm405_vm1, %v1349_v44, 0.0  ;;  %v158_v17 = vadd.f32 %v157_v31, %v151_v10 }
 0x1c0   :  { %v450_v51 = vsel %vm405_vm1, %v1351_v47, 0.0 }
 0x1c1   :  { %v451_v59 = vadd.f32 %v450_v51, %v449_v50  ;;  %v159_v29 = vadd.f32 %v158_v17, %v152_v16  ;;  %v156_v51 = vmul.f32 %v1205_v19, %v1205_v19  ;;  %v109_v16 = vsel %vm92_vm6, %v1393_v21, 0.0 }
 0x1c2   :  { %490 = vadd.xlane.f32.xlu2 %v489_v34  ;;  %484 = vadd.xlane.f32.xlu0 %v483_v35  ;;  %v135_v34 = vadd.f32 %v134_v13, %v128_v12  ;;  %v153_v35 = vmul.f32 %v1212_v20, %v1212_v20  ;;  %v132_v20 = vmul.f32 %v1112_v1, %v1112_v1 }
 0x1c4   :  { %v136_v32 = vadd.f32 %v135_v34, %v129_v28  ;;  %v160_v36 = vadd.f32 %v159_v29, %v153_v35  ;;  %v1427_v29 = vpop.xlane.xlu1 %90 }
 0x1c6   :  { %v161_v61 = vadd.f32 %v160_v36, %v154_v33  ;;  %v1395_v63 = vpop.xlane.xlu0 %84 }
 0x1c7   :  { %v110_v17 = vsel %vm92_vm6, %v1395_v63, 0.0 }
 0x1c8   :  { %v162_v52 = vadd.f32 %v161_v61, %v155_v60  ;;  %v111_v33 = vadd.f32 %v110_v17, %v109_v16 }
 0x1ca   :  { %87 = vadd.xlane.f32.xlu0 %v86_v37  ;;  %100 = vadd.xlane.f32.xlu2 %v99_v55  ;;  %v137_v37 = vadd.f32 %v136_v32, %v130_v22 }
 0x1cc   :  { %v138_v50 = vadd.f32 %v137_v37, %v131_v23 }
 0x1ce   :  { %v139_v58 = vadd.f32 %v138_v50, %v132_v20  ;;  %v114_v20 = vsel %vm92_vm6, %v1427_v29, 0.0 }
 0x1d2   :  { %452 = vadd.xlane.f32.xlu0 %v451_v59  ;;  %v163_v59 = vadd.f32 %v162_v52, %v156_v51 }
 0x1d4   :  { %164 = vadd.xlane.f32.xlu2 %v163_v59 }
 0x1da   :  { %140 = vadd.xlane.f32.xlu0 %v139_v58 }
 0x22d   :  { %v1397_v3 = vpop.xlane.xlu2 %487  ;;  %v1399_v18 = vpop.xlane.xlu0 %481 }
 0x22e   :  { %v510_v55 = vmul.f32 %v1399_v18, %v70_v38  ;;  %v532_v19 = vmul.f32 %v1399_v18, %v1399_v18  ;;  %v512_v7 = vmul.f32 %v1397_v3, %v76_v57  ;;  %v534_v10 = vmul.f32 %v1397_v3, %v1397_v3 }
 0x22f   :  { %v492_v52 = vsel %vm92_vm6, %v1399_v18, 0.0 }
 0x230   :  { %v514_v38 = vsel %vm92_vm6, %v510_v55, 0.0  ;;  %v539_v35 = vsel %vm92_vm6, %v534_v10, 0.0  ;;  %v495_v55 = vsel %vm92_vm6, %v1397_v3, 0.0 }
 0x235   :  { %v1402_v26 = vpop.xlane.xlu2 %490  ;;  %v1404_v27 = vpop.xlane.xlu0 %484 }
 0x236   :  { %v511_v56 = vmul.f32 %v1404_v27, %v73_v43  ;;  %v533_v30 = vmul.f32 %v1404_v27, %v1404_v27  ;;  %v513_v11 = vmul.f32 %v1402_v26, %v79_v62  ;;  %v535_v13 = vmul.f32 %v1402_v26, %v1402_v26 }
 0x237   :  { %v536_v43 = vsel %vm92_vm6, %v532_v19, 0.0  ;;  %v517_v62 = vsel %vm92_vm6, %v512_v7, 0.0  ;;  %v493_v50 = vsel %vm92_vm6, %v1404_v27, 0.0  ;;  %v497_v7 = vsel %vm92_vm6, %v1402_v26, 0.0 }
 0x238   :  { %v515_v31 = vsel %vm92_vm6, %v511_v56, 0.0  ;;  %v537_v57 = vsel %vm92_vm6, %v533_v30, 0.0  ;;  %v519_v22 = vsel %vm92_vm6, %v513_v11, 0.0  ;;  %v541_v37 = vsel %vm92_vm6, %v535_v13, 0.0 }
 0x239   :  { %v516_v12 = vadd.f32 %v515_v31, %v514_v38  ;;  %v538_v28 = vadd.f32 %v537_v57, %v536_v43  ;;  %v494_v59 = vadd.f32 %v493_v50, %v492_v52  ;;  %v317_v50 = vadd.f32 %v1295_v46, %v1321_v15 }
 0x23b   :  { %v518_v34 = vadd.f32 %v517_v62, %v516_v12  ;;  %v540_v32 = vadd.f32 %v539_v35, %v538_v28  ;;  %v496_v56 = vadd.f32 %v495_v55, %v494_v59 }
 0x23d   :  { %v1430_v36 = vpop.xlane.xlu0 %87  ;;  %v520_v23 = vadd.f32 %v519_v22, %v518_v34  ;;  %v542_v61 = vadd.f32 %v541_v37, %v540_v32  ;;  %v498_v30 = vadd.f32 %v497_v7, %v496_v56  ;;  %v101_v10 = vpop.xlane.xlu2 %100 }
 0x23e   :  { %v112_v60 = vsel %vm92_vm6, %v1430_v36, 0.0  ;;  %v102_v38 = vrot.slane %v101_v10, 4 }
 0x23f   :  { %v113_v51 = vadd.f32 %v112_v60, %v111_v33  ;;  %521 = vadd.xlane.f32.xlu0 %v520_v23  ;;  %543 = vadd.xlane.f32.xlu2 %v542_v61  ;;  %v285_v60 = vadd.f32 %v1285_v41, %v1325_v48  ;;  %v314_v61 = vadd.f32 %v1287_v42, %v1325_v48 }
 0x240   :  { %v103_v12 = vadd.f32 %v102_v38, %v101_v10  ;;  %v291_v41 = vadd.f32 %v1299_v53, %v1327_v49  ;;  %v320_v42 = vadd.f32 %v1301_v54, %v1327_v49 }
 0x241   :  { %v115_v58 = vadd.f32 %v114_v20, %v113_v51  ;;  %v288_v20 = vadd.f32 %v1293_v45, %v1321_v15 }
 0x242   :  { %v104_v57 = vrot.slane %v103_v12, 2 }
 0x243   :  { %116 = vadd.xlane.f32.xlu1 %v115_v58 }
 0x244   :  { %v105_v62 = vadd.f32 %v104_v57, %v103_v12 }
 0x245   :  { %v453_v19 = vpop.xlane.xlu0 %452 }
 0x246   :  { %1058 = vrcp.f32 %v453_v19  ;;  %v465_v43 = vand.u32 2147483648, %v453_v19  ;;  %v463_v17 = vand.u32 2147483647, %v453_v19  ;;  %vm459_vm8 = vweird.f32 %v453_v19 }
 0x247   :  { %v106_v35 = vrot.slane %v105_v62, 1  ;;  %v165_v53 = vpop.xlane.xlu2 %164 }
 0x248   :  { %v466_v34 = vor.u32 1.1754944e-38, %v465_v43  ;;  %vm464_vm10 = vcmp.eq.f32.partialorder %v463_v17, 8.507059e+37  ;;  %v166_v54 = vrot.slane %v165_v53, 4 }
 0x249   :  { %v107_v33 = vadd.f32 %v106_v35, %v105_v62 }
 0x24a   :  { %v167_v10 = vadd.f32 %v166_v54, %v165_v53 }
 0x24b   :  { %499 = vadd.xlane.f32.xlu1 %v498_v30  ;;  %1017 = vpush %v107_v33 }
 0x24c   :  { %v1059_v11 = vpop.eup %1058 }
 0x24d   :  { %v455_v31 = vmul.f32 %v1059_v11, %v453_v19  ;;  %vm460_vm7 = vweird.f32 %v1059_v11 }
 0x24e   :  { %vm461_vm9 = vmor %vm459_vm8, %vm460_vm7 }
 0x24f   :  { %v456_v13 = vsub.f32 1.0, %v455_v31 }
 0x251   :  { %v457_v16 = vmul.f32 %v1059_v11, %v456_v13  ;;  %v168_v13 = vrot.slane %v167_v10, 2 }
 0x253   :  { %v458_v28 = vadd.f32 %v1059_v11, %v457_v16  ;;  %v169_v35 = vadd.f32 %v168_v13, %v167_v10 }
 0x255   :  { %v462_v22 = vsel %vm461_vm9, %v1059_v11, %v458_v28  ;;  %v1073_v11 = vmov 8192.0  }
 0x256   :  { %v467_v32 = vsel %vm464_vm10, %v466_v34, %v462_v22  ;;  %1060 = vrcp.f32 %v1073_v11 }
 0x257   :  { %v468_v23 = vmul.f32 %v1349_v44, %v467_v32  ;;  %v469_v37 = vmul.f32 %v1351_v47, %v467_v32  ;;  %v282_v44 = vadd.f32 %v1281_v39, %v1319_v14  ;;  %v311_v47 = vadd.f32 %v1283_v40, %v1319_v14  ;;  %v141_v40 = vpop.xlane.xlu0 %140 }
 0x258   :  { %v142_v14 = vrot.slane %v141_v40, 4 }
 0x259   :  { %v621_v51 = vperm.slane %v468_v23, 0  ;;  %v622_v52 = vperm.slane %v469_v37, 0 }
 0x25a   :  { %v143_v49 = vadd.f32 %v142_v14, %v141_v40 }
 0x25b   :  { %v625_v48 = vmul.f32 %v621_v51, %v285_v60  ;;  %v626_v58 = vmul.f32 %v622_v52, %v314_v61  ;;  %v627_v45 = vmul.f32 %v621_v51, %v288_v20  ;;  %v628_v59 = vmul.f32 %v622_v52, %v317_v50 }
 0x25c   :  { %v623_v55 = vmul.f32 %v621_v51, %v282_v44  ;;  %v624_v46 = vmul.f32 %v622_v52, %v311_v47  ;;  %v629_v15 = vmul.f32 %v621_v51, %v291_v41  ;;  %v630_v19 = vmul.f32 %v622_v52, %v320_v42  ;;  %v1061_v62 = vpop.eup %1060 }
 0x25d   :  { %v634_v56 = vadd.f32 %v626_v58, %v625_v48  ;;  %v637_v7 = vadd.f32 %v628_v59, %v627_v45  ;;  %v144_v31 = vrot.slane %v143_v49, 2  ;;  %v555_v23 = vmul.f32 8192.0, %v1061_v62 }
 0x25e   :  { %v631_v39 = vadd.f32 %v624_v46, %v623_v55  ;;  %v640_v30 = vadd.f32 %v630_v19, %v629_v15  ;;  %v170_v61 = vrot.slane %v169_v35, 1  ;;  %vm559_vm11 = vweird.f32 %v1061_v62 }
 0x25f   :  { %635 = vadd.xlane.f32.xlu0 %v634_v56  ;;  %638 = vadd.xlane.f32.xlu2 %v637_v7  ;;  %v145_v28 = vadd.f32 %v144_v31, %v143_v49  ;;  %v556_v47 = vsub.f32 1.0, %v555_v23 }
 0x260   :  { %632 = vadd.xlane.f32.xlu1 %v631_v39  ;;  %v171_v58 = vadd.f32 %v170_v61, %v169_v35 }
 0x261   :  { %v146_v37 = vrot.slane %v145_v28, 1  ;;  %v557_v46 = vmul.f32 %v1061_v62, %v556_v47 }
 0x263   :  { %v147_v41 = vadd.f32 %v146_v37, %v145_v28  ;;  %v558_v39 = vadd.f32 %v1061_v62, %v557_v46 }
 0x265   :  { %v560_v14 = vsel %vm559_vm11, %v1061_v62, %v558_v39 }
 0x268   :  { %641 = vadd.xlane.f32.xlu1 %v640_v30 }
 0x27c   :  { %s1018_s16 = spop %1017 }
 0x2b2   :  { %v522_v38 = vpop.xlane.xlu0 %521  ;;  %v544_v12 = vpop.xlane.xlu2 %543 }
 0x2b3   :  { %v523_v43 = vrot.slane %v522_v38, 4  ;;  %v545_v16 = vrot.slane %v544_v12, 4 }
 0x2b5   :  { %v524_v22 = vadd.f32 %v523_v43, %v522_v38  ;;  %v546_v32 = vadd.f32 %v545_v16, %v544_v12 }
 0x2b6   :  { %v117_v57 = vpop.xlane.xlu1 %116 }
 0x2b7   :  { %v118_v17 = vrot.slane %v117_v57, 4  ;;  %v525_v20 = vrot.slane %v524_v22, 2  ;;  %v547_v51 = vrot.slane %v546_v32, 2 }
 0x2b9   :  { %v119_v34 = vadd.f32 %v118_v17, %v117_v57  ;;  %v526_v45 = vadd.f32 %v525_v20, %v524_v22  ;;  %v548_v55 = vadd.f32 %v547_v51, %v546_v32 }
 0x2bb   :  { %v120_v33 = vrot.slane %v119_v34, 2  ;;  %v527_v19 = vrot.slane %v526_v45, 1  ;;  %v549_v7 = vrot.slane %v548_v55, 1 }
 0x2bd   :  { %v121_v60 = vadd.f32 %v120_v33, %v119_v34  ;;  %v528_v40 = vadd.f32 %v527_v19, %v526_v45  ;;  %v550_v53 = vadd.f32 %v549_v7, %v548_v55  ;;  %v1520_v45 = vadd.f32 %v1399_v18, %v1144_v8 }
 0x2be   :  { %v500_v50 = vpop.xlane.xlu1 %499 }
 0x2bf   :  { %v501_v52 = vrot.slane %v500_v50, 4  ;;  %v122_v44 = vrot.slane %v121_v60, 1 }
 0x2c1   :  { %v502_v42 = vadd.f32 %v501_v52, %v500_v50  ;;  %v123_v48 = vadd.f32 %v122_v44, %v121_v60 }
 0x2c3   :  { %v503_v59 = vrot.slane %v502_v42, 2  ;;  %1019 = vpush %v123_v48  ;;  %v594_v48 = vadd.f32 %v1402_v26, %v1112_v1  ;;  %v1530_v1 = vadd.f32 %v1399_v18, %v1149_v9 }
 0x2c4   :  { %1021 = vpush %v147_v41 }
 0x2c5   :  { %1023 = vpush %v171_v58  ;;  %v504_v15 = vadd.f32 %v503_v59, %v502_v42  ;;  %v593_v42 = vadd.f32 %v1402_v26, %v1107_v0  ;;  %v592_v58 = vadd.f32 %v1397_v3, %v1124_v4  ;;  %v590_v0 = vadd.f32 %v1404_v27, %v1134_v6 }
 0x2c7   :  { %v505_v56 = vrot.slane %v504_v15, 1 }
 0x2c9   :  { %v506_v30 = vadd.f32 %v505_v56, %v504_v15 }
 0x2cb   :  { %1025 = vpush %v506_v30  ;;  %v1546_v30 = vld [vmem:[%s1757_s4 + $0x30] sm:$0xff] }
 0x2cc   :  { %1027 = vpush %v528_v40  ;;  %v1551_v40 = vld [vmem:[%s1757_s4 + $0x38] sm:$0xff] }
 0x2cd   :  { %1029 = vpush %v550_v53  ;;  %v1556_v53 = vld [vmem:[%s1757_s4 + $0x20] sm:$0xff] }
 0x2ce   :  { %1031 = vpush %v560_v14  ;;  %v1561_v14 = vld [vmem:[%s1757_s4 + $0x28] sm:$0xff] }
 0x2d2   :  { %v1463_v54 = vpop.xlane.xlu0 %635  ;;  %v1479_v43 = vpop.xlane.xlu2 %638 }
 0x2d3   :  { %v1465_v49 = vpop.xlane.xlu1 %632  ;;  %v644_v10 = vsel %vm92_vm6, %v1463_v54, 0.0  ;;  %v684_v11 = vmul.f32 %v1463_v54, %v1463_v54  ;;  %v662_v13 = vmul.f32 %v1463_v54, %v1395_v63  ;;  %v685_v34 = vmul.f32 %v1479_v43, %v1479_v43 }
 0x2d4   :  { %v643_v38 = vsel %vm92_vm6, %v1465_v49, 0.0  ;;  %v683_v31 = vmul.f32 %v1465_v49, %v1465_v49  ;;  %v661_v12 = vmul.f32 %v1465_v49, %v1393_v21  ;;  %v663_v21 = vmul.f32 %v1479_v43, %v1430_v36 }
 0x2d5   :  { %v688_v16 = vsel %vm92_vm6, %v684_v11, 0.0  ;;  %v645_v17 = vadd.f32 %v644_v10, %v643_v38  ;;  %v666_v28 = vsel %vm92_vm6, %v662_v13, 0.0  ;;  %v646_v63 = vsel %vm92_vm6, %v1479_v43, 0.0  ;;  %v1566_v11 = vld [vmem:[%s1757_s4 + $0x10] sm:$0xff]  ;;  %v1571_v38 = vld [vmem:[%s1757_s4 + $0x18] sm:$0xff] }
 0x2d6   :  { %v687_v57 = vsel %vm92_vm6, %v683_v31, 0.0  ;;  %v665_v62 = vsel %vm92_vm6, %v661_v12, 0.0  ;;  %v690_v60 = vsel %vm92_vm6, %v685_v34, 0.0  ;;  %v668_v50 = vsel %vm92_vm6, %v663_v21, 0.0 }
 0x2d7   :  { %v689_v35 = vadd.f32 %v688_v16, %v687_v57  ;;  %v667_v22 = vadd.f32 %v666_v28, %v665_v62  ;;  %v647_v33 = vadd.f32 %v646_v63, %v645_v17  ;;  %v1580_v16 = vld [vmem:[%s1757_s4] sm:$0xff]  ;;  %v1585_v17 = vld [vmem:[%s1757_s4 + $0x8] sm:$0xff] }
 0x2d9   :  { %v691_v20 = vadd.f32 %v690_v60, %v689_v35  ;;  %v669_v52 = vadd.f32 %v668_v50, %v667_v22 }
 0x2db   :  { %v1491_v32 = vpop.xlane.xlu1 %641 }
 0x2dc   :  { %v648_v23 = vsel %vm92_vm6, %v1491_v32, 0.0  ;;  %v686_v37 = vmul.f32 %v1491_v32, %v1491_v32  ;;  %v664_v36 = vmul.f32 %v1491_v32, %v1427_v29  ;;  %v591_v29 = vadd.f32 %v1397_v3, %v1117_v2 }
 0x2dd   :  { %v649_v61 = vadd.f32 %v648_v23, %v647_v33  ;;  %v589_v2 = vadd.f32 %v1404_v27, %v1129_v5 }
 0x2de   :  { %v692_v51 = vsel %vm92_vm6, %v686_v37, 0.0  ;;  %v670_v47 = vsel %vm92_vm6, %v664_v36, 0.0 }
 0x2df   :  { %650 = vadd.xlane.f32.xlu0 %v649_v61  ;;  %v693_v44 = vadd.f32 %v692_v51, %v691_v20  ;;  %v671_v41 = vadd.f32 %v670_v47, %v669_v52 }
 0x2e1   :  { %694 = vadd.xlane.f32.xlu1 %v693_v44  ;;  %672 = vadd.xlane.f32.xlu2 %v671_v41 }
 0x2f4   :  { %s1503_s17 = spop %1019 }
 0x2f5   :  { %s1022_s18 = spop %1021 }
 0x2f6   :  { %s1505_s19 = spop %1023 }
 0x2fc   :  { %s1026_s20 = spop %1025 }
 0x2fd   :  { %s508_s21 = smul.f32 256.0, %s1026_s20  ;;  %s1028_s22 = spop %1027 }
 0x2fe   :  { %s530_s23 = smul.f32 2.0, %s1028_s22  ;;  %s1030_s24 = spop %1029 }
 0x2ff   :  { %s509_s2 = sadd.f32 %s1018_s16, %s508_s21  ;;  %s552_s25 = smul.f32 256.0, %s1030_s24 }
 0x300   :  { %s531_s26 = sadd.f32 %s1022_s18, %s530_s23  ;;  %s1507_s27 = spop %1031 }
 0x301   :  { %s562_s28 = smul.f32 %s1507_s27, %s509_s2 }
 0x302   :  { %s553_s29 = sadd.f32 %s552_s25, %s531_s26 }
 0x303   :  { %s572_s30 = smul.f32 %s562_s28, %s562_s28  ;;  %v1522_v59 = vstv %s562_s28 }
 0x304   :  { %s571_s1 = smul.f32 %s1507_s27, %s553_s29  ;;  %v602_v4 = vsub.f32 %v593_v42, %v1522_v59  ;;  %v603_v3 = vsub.f32 %v594_v48, %v1522_v59  ;;  %v600_v8 = vsub.f32 %v591_v29, %v1522_v59  ;;  %v601_v26 = vsub.f32 %v592_v58, %v1522_v59 }
 0x305   :  { %v598_v55 = vsub.f32 %v589_v2, %v1522_v59  ;;  %v599_v5 = vsub.f32 %v590_v0, %v1522_v59  ;;  %v596_v6 = vsub.f32 %v1520_v45, %v1522_v59  ;;  %v597_v9 = vsub.f32 %v1530_v1, %v1522_v59 }
 0x306   :  { %s573_s6 = ssub.f32 %s571_s1, %s572_s30 }
 0x308   :  { %s574_s7 = sadd.f32 1e-05, %s573_s6 }
 0x30a   :  { %v575_v18 = vstv %s574_s7 }
 0x30b   :  { %1062 = vrsqrt.f32 %v575_v18  ;;  %vm582_vm13 = vweird.f32 %v575_v18 }
 0x311   :  { %v1063_v27 = vpop.eup %1062 }
 0x312   :  { %v577_v46 = vmul.f32 %v1063_v27, %v575_v18  ;;  %vm583_vm12 = vweird.f32 %v1063_v27 }
 0x313   :  { %vm584_vm14 = vmor %vm582_vm13, %vm583_vm12 }
 0x314   :  { %v578_v15 = vmul.f32 %v1063_v27, %v577_v46 }
 0x316   :  { %v579_v19 = vmul.f32 0.5, %v578_v15 }
 0x318   :  { %v580_v56 = vsub.f32 1.5, %v579_v19 }
 0x31a   :  { %v581_v7 = vmul.f32 %v1063_v27, %v580_v56 }
 0x31c   :  { %v585_v39 = vsel %vm584_vm14, %v1063_v27, %v581_v7  ;;  %v953_v7 = vld [vmem:[%s1755_s3 + $0x20] sm:$0xff] }
 0x31d   :  { %1033 = vpush %v585_v39  ;;  %v954_v39 = vld [vmem:[%s1755_s3 + $0x28] sm:$0xff] }
 0x34e   :  { %s1034_s16 = spop %1033 }
 0x34f   :  { %v604_v10 = vstv %s1034_s16 }
 0x350   :  { %v611_v31 = vmul.f32 %v604_v10, %v1546_v30  ;;  %v612_v12 = vmul.f32 %v604_v10, %v1551_v40  ;;  %v609_v13 = vmul.f32 %v604_v10, %v1556_v53  ;;  %v610_v57 = vmul.f32 %v604_v10, %v1561_v14 }
 0x351   :  { %v607_v35 = vmul.f32 %v604_v10, %v1566_v11  ;;  %v608_v21 = vmul.f32 %v604_v10, %v1571_v38  ;;  %v605_v22 = vmul.f32 %v604_v10, %v1580_v16  ;;  %v606_v60 = vmul.f32 %v604_v10, %v1585_v17  ;;  %v955_v10 = vld [vmem:[%s1755_s3 + $0x30] sm:$0xff] }
 0x352   :  { %v651_v62 = vpop.xlane.xlu0 %650  ;;  %v619_v28 = vmul.f32 %v611_v31, %v602_v4  ;;  %v620_v34 = vmul.f32 %v612_v12, %v603_v3  ;;  %v617_v23 = vmul.f32 %v609_v13, %v600_v8  ;;  %v618_v37 = vmul.f32 %v610_v57, %v601_v26  ;;  %v1066_v31 = vld [vmem:[%s1753_s0 + $0x70] sm:$0xff]  ;;  %v1067_v13 = vld [vmem:[%s1753_s0 + $0x78] sm:$0xff] }
 0x353   :  { %v652_v63 = vrot.slane %v651_v62, 4  ;;  %v615_v51 = vmul.f32 %v607_v35, %v598_v55  ;;  %v616_v52 = vmul.f32 %v608_v21, %v599_v5  ;;  %v613_v29 = vmul.f32 %v605_v22, %v596_v6 }
 0x354   :  { %796 = vmatpush.msra.mxu0 %v619_v28  ;;  %825 = vmatpush.msra.mxu1 %v620_v34  ;;  %v695_v33 = vpop.xlane.xlu1 %694  ;;  %v673_v36 = vpop.xlane.xlu2 %672  ;;  %v614_v42 = vmul.f32 %v606_v60, %v597_v9  ;;  %v1598_v5 = vadd.f32 %v1234_v24, %v1465_v49  ;;  %v1602_v6 = vadd.f32 %v1239_v25, %v1465_v49 }
 0x355   :  { %v653_v61 = vadd.f32 %v652_v63, %v651_v62  ;;  %v696_v20 = vrot.slane %v695_v33, 4  ;;  %v674_v50 = vrot.slane %v673_v36, 4  ;;  %v744_v12 = vadd.f32 %v1066_v31, %v1491_v32  ;;  %v1068_v62 = vld [vmem:[%s1753_s0 + $0x60] sm:$0xff]  ;;  %v1069_v63 = vld [vmem:[%s1753_s0 + $0x68] sm:$0xff] }
 0x356   :  { %797 = vmatpush.msra.mxu0 %v617_v23  ;;  %826 = vmatpush.msra.mxu1 %v618_v37  ;;  %v745_v57 = vadd.f32 %v1067_v13, %v1491_v32  ;;  %v742_v28 = vadd.f32 %v1068_v62, %v1479_v43  ;;  %v743_v22 = vadd.f32 %v1069_v63, %v1479_v43  ;;  %v1071_v43 = vld [vmem:[%s1753_s0 + $0x58] sm:$0xff] }
 0x357   :  { %v654_v44 = vrot.slane %v653_v61, 2  ;;  %v697_v47 = vadd.f32 %v696_v20, %v695_v33  ;;  %v675_v41 = vadd.f32 %v674_v50, %v673_v36  ;;  %v1070_v20 = vld [vmem:[%s1753_s0 + $0x50] sm:$0xff] }
 0x358   :  { %798 = vmatpush.msra.mxu0 %v615_v51  ;;  %827 = vmatpush.msra.mxu1 %v616_v52  ;;  %v740_v36 = vadd.f32 %v1070_v20, %v1463_v54  ;;  %v956_v51 = vld [vmem:[%s1755_s3 + $0x38] sm:$0xff] }
 0x359   :  { %v655_v48 = vadd.f32 %v654_v44, %v653_v61  ;;  %v698_v58 = vrot.slane %v697_v47, 2  ;;  %v676_v45 = vrot.slane %v675_v41, 2 }
 0x35a   :  { %799 = vmatpush.msra.mxu0 %v613_v29  ;;  %828 = vmatpush.msra.mxu1 %v614_v42 }
 0x35b   :  { %v699_v59 = vadd.f32 %v698_v58, %v697_v47  ;;  %v656_v2 = vrot.slane %v655_v48, 1  ;;  %v677_v0 = vadd.f32 %v676_v45, %v675_v41  ;;  %993 = vmatmul.msk.f32.vlgmr.msra.gmra.mxu0 %vm193_vm0, %v953_v7  ;;  %997 = vmatmul.msk.f32.vlgmr.msra.gmra.mxu1 %vm193_vm0, %v953_v7 }
 0x35d   :  { %v657_v1 = vadd.f32 %v656_v2, %v655_v48  ;;  %v700_v4 = vrot.slane %v699_v59, 1  ;;  %v678_v3 = vrot.slane %v677_v0, 1  ;;  %v958_v48 = vld [vmem:[%s1757_s4 + $0x48] sm:$0xff] }
 0x35f   :  { %1035 = vpush %v657_v1  ;;  %v701_v8 = vadd.f32 %v700_v4, %v699_v59  ;;  %v679_v26 = vadd.f32 %v678_v3, %v677_v0  ;;  %v959_v4 = vld [vmem:[%s1757_s4 + $0x50] sm:$0xff] }
 0x361   :  { %1037 = vpush %v679_v26 }
 0x362   :  { %1039 = vpush %v701_v8  ;;  %v960_v8 = vld [vmem:[%s1757_s4 + $0x58] sm:$0xff] }
 0x363   :  { %994 = vmatmul.msk.f32.gmra.mxu0 %vm193_vm0, %v954_v39  ;;  %998 = vmatmul.msk.f32.gmra.mxu1 %vm193_vm0, %v954_v39 }
 0x36b   :  { %995 = vmatmul.msk.f32.gmra.mxu0 %vm193_vm0, %v955_v10  ;;  %999 = vmatmul.msk.f32.gmra.mxu1 %vm193_vm0, %v955_v10 }
 0x373   :  { %996 = vmatmul.msk.f32.gmra.mxu0 %vm193_vm0, %v956_v51  ;;  %1000 = vmatmul.msk.f32.gmra.mxu1 %vm193_vm0, %v956_v51 }
 0x390   :  { %s1036_s26 = spop %1035 }
 0x391   :  { %s659_s28 = smul.f32 256.0, %s1036_s26 }
 0x392   :  { %s1038_s30 = spop %1037 }
 0x393   :  { %s660_s29 = sadd.f32 %s1503_s17, %s659_s28  ;;  %s681_s1 = smul.f32 2.0, %s1038_s30 }
 0x394   :  { %s1040_s6 = spop %1039 }
 0x395   :  { %s713_s7 = smul.f32 %s1507_s27, %s660_s29  ;;  %s682_s8 = sadd.f32 %s1505_s19, %s681_s1 }
 0x396   :  { %s703_s9 = smul.f32 256.0, %s1040_s6 }
 0x397   :  { %v1594_v55 = vstv %s713_s7  ;;  %s723_s11 = smul.f32 %s713_s7, %s713_s7 }
 0x398   :  { %s704_s10 = sadd.f32 %s703_s9, %s682_s8  ;;  %v747_v9 = vsub.f32 %v1598_v5, %v1594_v55  ;;  %v748_v18 = vsub.f32 %v1602_v6, %v1594_v55  ;;  %v753_v35 = vsub.f32 %v744_v12, %v1594_v55  ;;  %v754_v21 = vsub.f32 %v745_v57, %v1594_v55 }
 0x399   :  { %v751_v60 = vsub.f32 %v742_v28, %v1594_v55  ;;  %v752_v61 = vsub.f32 %v743_v22, %v1594_v55  ;;  %v749_v52 = vsub.f32 %v740_v36, %v1594_v55 }
 0x39a   :  { %s722_s17 = smul.f32 %s1507_s27, %s704_s10 }
 0x39c   :  { %s724_s19 = ssub.f32 %s722_s17, %s723_s11 }
 0x39e   :  { %s725_s12 = sadd.f32 1e-05, %s724_s19 }
 0x3a0   :  { %v726_v27 = vstv %s725_s12 }
 0x3a1   :  { %1064 = vrsqrt.f32 %v726_v27  ;;  %vm733_vm1 = vweird.f32 %v726_v27 }
 0x3a7   :  { %v1065_v46 = vpop.eup %1064 }
 0x3a8   :  { %v728_v24 = vmul.f32 %v1065_v46, %v726_v27  ;;  %vm734_vm15 = vweird.f32 %v1065_v46 }
 0x3a9   :  { %vm735_vm2 = vmor %vm733_vm1, %vm734_vm15 }
 0x3aa   :  { %v729_v15 = vmul.f32 %v1065_v46, %v728_v24 }
 0x3ac   :  { %v730_v19 = vmul.f32 0.5, %v729_v15 }
 0x3ae   :  { %v731_v56 = vsub.f32 1.5, %v730_v19 }
 0x3b0   :  { %v732_v25 = vmul.f32 %v1065_v46, %v731_v56 }
 0x3b2   :  { %v736_v49 = vsel %vm735_vm2, %v1065_v46, %v732_v25  ;;  %v962_v46 = vld [vmem:[%s1757_s4 + $0x68] sm:$0xff] }
 0x3b3   :  { %1041 = vpush %v736_v49  ;;  %v963_v49 = vld [vmem:[%s1757_s4 + $0x70] sm:$0xff] }
 0x3d8   :  { %v801_v58 = vpop.f32.mrf.mxu0  ;;  %v830_v45 = vpop.f32.mrf.mxu1 }
 0x3d9   :  { %v901_v2 = vadd.f32 %v958_v48, %v830_v45 }
 0x3db   :  { %v909_v1 = vmax.f32 %v901_v2, 0.0 }
 0x3dd   :  { %917 = vst [vmem:[%s1758_s5 + $0x8] sm:$0xff] %v909_v1 }
 0x3e0   :  { %v804_v3 = vpop.f32.mrf.mxu0  ;;  %v833_v26 = vpop.f32.mrf.mxu1 }
 0x3e1   :  { %v903_v5 = vadd.f32 %v960_v8, %v833_v26 }
 0x3e4   :  { %s1042_s24 = spop %1041 }
 0x3e5   :  { %v755_v34 = vstv %s1042_s24 }
 0x3e6   :  { %v762_v32 = vmul.f32 %v755_v34, %v1546_v30  ;;  %v763_v33 = vmul.f32 %v755_v34, %v1551_v40  ;;  %v760_v23 = vmul.f32 %v755_v34, %v1556_v53  ;;  %v761_v37 = vmul.f32 %v755_v34, %v1561_v14 }
 0x3e7   :  { %v741_v30 = vadd.f32 %v1071_v43, %v1463_v54  ;;  %v758_v14 = vmul.f32 %v755_v34, %v1566_v11  ;;  %v759_v50 = vmul.f32 %v755_v34, %v1571_v38  ;;  %v756_v47 = vmul.f32 %v755_v34, %v1580_v16 }
 0x3e8   :  { %v770_v40 = vmul.f32 %v762_v32, %v753_v35  ;;  %v771_v53 = vmul.f32 %v763_v33, %v754_v21  ;;  %v768_v54 = vmul.f32 %v760_v23, %v751_v60  ;;  %v769_v41 = vmul.f32 %v761_v37, %v752_v61  ;;  %v807_v27 = vpop.f32.mrf.mxu0  ;;  %v836_v24 = vpop.f32.mrf.mxu1 }
 0x3e9   :  { %v750_v44 = vsub.f32 %v741_v30, %v1594_v55  ;;  %v757_v11 = vmul.f32 %v755_v34, %v1585_v17  ;;  %v766_v38 = vmul.f32 %v758_v14, %v749_v52  ;;  %v764_v16 = vmul.f32 %v756_v47, %v747_v9  ;;  %v957_v17 = vld [vmem:[%s1757_s4 + $0x40] sm:$0xff] }
 0x3ea   :  { %854 = vmatpush.msra.mxu2 %v770_v40  ;;  %883 = vmatpush.msra.mxu3 %v771_v53  ;;  %v900_v59 = vadd.f32 %v957_v17, %v801_v58  ;;  %v902_v55 = vadd.f32 %v959_v4, %v804_v3  ;;  %v911_v9 = vmax.f32 %v903_v5, 0.0  ;;  %v905_v19 = vadd.f32 %v962_v46, %v836_v24 }
 0x3eb   :  { %v767_v29 = vmul.f32 %v759_v50, %v750_v44  ;;  %v765_v42 = vmul.f32 %v757_v11, %v748_v18  ;;  %v961_v18 = vld [vmem:[%s1757_s4 + $0x60] sm:$0xff] }
 0x3ec   :  { %855 = vmatpush.msra.mxu2 %v768_v54  ;;  %884 = vmatpush.msra.mxu3 %v769_v41  ;;  %v908_v0 = vmax.f32 %v900_v59, 0.0  ;;  %v910_v6 = vmax.f32 %v902_v55, 0.0  ;;  %919 = vst [vmem:[%s1758_s5 + $0x18] sm:$0xff] %v911_v9  ;;  %v904_v15 = vadd.f32 %v961_v18, %v807_v27  ;;  %v913_v25 = vmax.f32 %v905_v19, 0.0 }
 0x3ee   :  { %856 = vmatpush.msra.mxu2 %v766_v38  ;;  %885 = vmatpush.msra.mxu3 %v767_v29  ;;  %916 = vst [vmem:[%s1758_s5] sm:$0xff] %v908_v0  ;;  %v912_v56 = vmax.f32 %v904_v15, 0.0 }
 0x3ef   :  { %918 = vst [vmem:[%s1758_s5 + $0x10] sm:$0xff] %v910_v6 }
 0x3f0   :  { %857 = vmatpush.msra.mxu2 %v764_v16  ;;  %886 = vmatpush.msra.mxu3 %v765_v42  ;;  %920 = vst [vmem:[%s1758_s5 + $0x20] sm:$0xff] %v912_v56 }
 0x3f1   :  { %1001 = vmatmul.msk.f32.vlgmr.msra.gmra.mxu2 %vm193_vm0, %v953_v7  ;;  %1005 = vmatmul.msk.f32.vlgmr.msra.gmra.mxu3 %vm193_vm0, %v953_v7  ;;  %921 = vst [vmem:[%s1758_s5 + $0x28] sm:$0xff] %v913_v25  ;;  %v810_v7 = vpop.f32.mrf.mxu0 }
 0x3f2   :  { %v906_v31 = vadd.f32 %v963_v49, %v810_v7 }
 0x3f4   :  { %v914_v13 = vmax.f32 %v906_v31, 0.0 }
 0x3f6   :  { %922 = vst [vmem:[%s1758_s5 + $0x30] sm:$0xff] %v914_v13 }
 0x3f9   :  { %1002 = vmatmul.msk.f32.gmra.mxu2 %vm193_vm0, %v954_v39  ;;  %1006 = vmatmul.msk.f32.gmra.mxu3 %vm193_vm0, %v954_v39  ;;  %v964_v39 = vld [vmem:[%s1757_s4 + $0x78] sm:$0xff] }
 0x401   :  { %1003 = vmatmul.msk.f32.gmra.mxu2 %vm193_vm0, %v955_v10  ;;  %1007 = vmatmul.msk.f32.gmra.mxu3 %vm193_vm0, %v955_v10  ;;  %v839_v10 = vpop.f32.mrf.mxu1 }
 0x402   :  { %v907_v12 = vadd.f32 %v964_v39, %v839_v10 }
 0x404   :  { %v915_v57 = vmax.f32 %v907_v12, 0.0 }
 0x406   :  { %923 = vst [vmem:[%s1758_s5 + $0x38] sm:$0xff] %v915_v57 }
 0x409   :  { %1004 = vmatmul.msk.f32.gmra.mxu2 %vm193_vm0, %v956_v51  ;;  %1008 = vmatmul.msk.f32.gmra.mxu3 %vm193_vm0, %v956_v51 }
 0x474   :  { %v859_v62 = vpop.f32.mrf.mxu2  ;;  %v888_v28 = vpop.f32.mrf.mxu3 }
 0x475   :  { %v924_v34 = vadd.f32 %v957_v17, %v859_v62  ;;  %v925_v35 = vadd.f32 %v958_v48, %v888_v28 }
 0x477   :  { %v932_v21 = vmax.f32 %v924_v34, 0.0  ;;  %v933_v63 = vmax.f32 %v925_v35, 0.0 }
 0x479   :  { %1009 = vst [vmem:[%s1758_s5 + $0x40] sm:$0xff] %v932_v21 }
 0x47a   :  { %1010 = vst [vmem:[%s1758_s5 + $0x48] sm:$0xff] %v933_v63 }
 0x47c   :  { %v862_v22 = vpop.f32.mrf.mxu2  ;;  %v891_v32 = vpop.f32.mrf.mxu3 }
 0x47d   :  { %v926_v33 = vadd.f32 %v959_v4, %v862_v22  ;;  %v927_v23 = vadd.f32 %v960_v8, %v891_v32 }
 0x47f   :  { %v934_v37 = vmax.f32 %v926_v33, 0.0  ;;  %v935_v60 = vmax.f32 %v927_v23, 0.0 }
 0x481   :  { %1011 = vst [vmem:[%s1758_s5 + $0x50] sm:$0xff] %v934_v37 }
 0x482   :  { %1012 = vst [vmem:[%s1758_s5 + $0x58] sm:$0xff] %v935_v60 }
 0x484   :  { %v865_v61 = vpop.f32.mrf.mxu2  ;;  %v894_v20 = vpop.f32.mrf.mxu3 }
 0x485   :  { %v928_v36 = vadd.f32 %v961_v18, %v865_v61  ;;  %v929_v43 = vadd.f32 %v962_v46, %v894_v20 }
 0x487   :  { %v936_v30 = vmax.f32 %v928_v36, 0.0  ;;  %v937_v40 = vmax.f32 %v929_v43, 0.0 }
 0x489   :  { %1013 = vst [vmem:[%s1758_s5 + $0x60] sm:$0xff] %v936_v30 }
 0x48a   :  { %1014 = vst [vmem:[%s1758_s5 + $0x68] sm:$0xff] %v937_v40 }
 0x48c   :  { %v868_v53 = vpop.f32.mrf.mxu2  ;;  %v897_v14 = vpop.f32.mrf.mxu3 }
 0x48d   :  { %v930_v50 = vadd.f32 %v963_v49, %v868_v53  ;;  %v931_v51 = vadd.f32 %v964_v39, %v897_v14 }
 0x48f   :  { %v938_v52 = vmax.f32 %v930_v50, 0.0  ;;  %v939_v44 = vmax.f32 %v931_v51, 0.0 }
 0x491   :  { %1015 = vst [vmem:[%s1758_s5 + $0x70] sm:$0xff] %v938_v52 }
 0x492   :  { %1016 = vst [vmem:[%s1758_s5 + $0x78] sm:$0xff] %v939_v44 }

</bundles_post_ra>
